<compile_context>
chip_gen: v7x
topology: tpu7x:2x2x1
jax: 0.10.0
libtpu: 0.0.40
codegen_flags: <defaults>
</compile_context>

<pallas_src>
import functools

import jax
import jax.numpy as jnp
from jax import lax
from jax.experimental import pallas as pl
from jax.experimental.pallas import tpu as pltpu


def _custom_loss_kernel(x_ref, out_ref, *, temperature):
    # x_ref: (4, B, D) f32 in VMEM, order = [english, etok, ktoe, korean]
    # out_ref: (1, 128) f32, lanes 0/1/2 = contrastive / cohesion / separation
    x = x_ref[...].astype(jnp.float32)                     # (4, B, D) raw embeddings
    _, B, D = x.shape
    eps = 1e-12

    # ---- L2 normalize (torch F.normalize p=2 dim=1) via rsqrt (EUP) ----------
    sumsq = jnp.sum(x * x, axis=2, keepdims=True)          # (4, B, 1)
    x_n = x * lax.rsqrt(jnp.maximum(sumsq, eps * eps))     # (4, B, D) normalized

    # ---- contrastive loss -----------------------------------------------------
    # Fold 1/temperature into the anchor once; one fused (B, 3B) matmul
    # (anchor @ [etok; ktoe; kor]^T) instead of three tiny ones + transposes.
    inv_t = 1.0 / temperature
    eng_s = x_n[0] * inv_t                                 # (B, D) scaled anchor
    pos_cat = x_n[1:4].reshape(3 * B, D)                   # (3B, D)
    logits = lax.dot_general(
        eng_s, pos_cat,
        dimension_numbers=(((1,), (1,)), ((), ())),        # contract on D, no .T
        preferred_element_type=jnp.float32,
    )                                                      # (B, 3B)

    contrastive = jnp.zeros((1, 1), jnp.float32)
    for i in range(3):
        block = logits[:, i * B:(i + 1) * B]               # (B, B) logits for pair i
        # positive-pair logit via row-wise dot (no iota masks / diag extraction)
        diag = jnp.sum(eng_s * x_n[i + 1], axis=1, keepdims=True)      # (B, 1)
        # numerically-stable logsumexp form: log(sum exp) - diag
        m = jnp.max(block, axis=1, keepdims=True)
        lse = jnp.log(jnp.sum(jnp.exp(block - m), axis=1, keepdims=True)) + m
        contrastive = contrastive + jnp.mean(lse - diag, keepdims=True)

    # ---- cluster centers (normalized) + cohesion (raw vs center, as in torch) -
    cohesion = jnp.zeros((1, 1), jnp.float32)
    centers = []
    for i in range(4):
        ci = jnp.mean(x_n[i], axis=0, keepdims=True)       # (1, D)
        centers.append(ci)
        diff = x[i] - ci                                   # raw embeddings (matches torch)
        dist = jnp.sqrt(jnp.sum(diff * diff, axis=1, keepdims=True))   # (B, 1)
        cohesion = cohesion + jnp.mean(dist, keepdims=True)

    # ---- separation: -mean over all 6 center pairs of ||ci - cj|| -------------
    sep_sum = jnp.zeros((1, 1), jnp.float32)
    for i in range(4):
        for j in range(i + 1, 4):
            d = centers[i] - centers[j]
            sep_sum = sep_sum + jnp.sqrt(jnp.sum(d * d, axis=1, keepdims=True))
    separation = -sep_sum / 6.0

    # ---- pack the three components into one lane-dense (1, 128) output -------
    lane = lax.broadcasted_iota(jnp.int32, (1, 128), 1)
    out_ref[...] = (jnp.where(lane == 0, contrastive, 0.0)
                    + jnp.where(lane == 1, cohesion, 0.0)
                    + jnp.where(lane == 2, separation, 0.0))


@functools.partial(
    jax.jit,
    static_argnames=("temperature", "lambda_cohesion", "lambda_separation"),
)
def _custom_loss_impl(stacked, *, temperature, lambda_cohesion, lambda_separation):
    # NOTE: gridless — the full (4, B, D) stack lives in VMEM. For very large B
    # (B ~ 2k, where the (B, 3B) logits approach the v7x VMEM budget) this would
    # need a row-tiled online-logsumexp grid; at training-loss batch sizes the
    # kernel is launch-overhead bound and gridless is optimal.
    kernel = functools.partial(_custom_loss_kernel, temperature=temperature)
    packed = pl.pallas_call(
        kernel,
        out_shape=jax.ShapeDtypeStruct((1, 128), jnp.float32),
        in_specs=[pl.BlockSpec(memory_space=pltpu.MemorySpace.VMEM)],
        out_specs=pl.BlockSpec(memory_space=pltpu.MemorySpace.VMEM),
    )(stacked)
    contrastive = packed[0, 0]
    cohesion = packed[0, 1]
    separation = packed[0, 2]
    total = contrastive + lambda_cohesion * cohesion + lambda_separation * separation
    return total, contrastive, cohesion, separation


def custom_loss(embeddings_dict, temperature=0.1,
                lambda_cohesion=1.0, lambda_separation=1.0):
    stacked = jnp.stack(
        [
            embeddings_dict['english'].astype(jnp.float32),
            embeddings_dict['etok'].astype(jnp.float32),
            embeddings_dict['ktoe'].astype(jnp.float32),
            embeddings_dict['korean'].astype(jnp.float32),
        ],
        axis=0,
    )                                                      # (4, B, D) — single input DMA
    total, contrastive, cohesion, separation = _custom_loss_impl(
        stacked,
        temperature=temperature,
        lambda_cohesion=lambda_cohesion,
        lambda_separation=lambda_separation,
    )
    # Keep JAX scalars (no float() host syncs) so this stays jit-/grad-friendly.
    breakdown = {
        'contrastive_loss': contrastive,
        'cohesion_loss': cohesion,
        'separation_loss': separation,
        'total_loss': total,
    }
    return total, breakdown


if __name__ == "__main__":
    B, D = 8, 32  # small shapes consistent with (batch_size, embedding_dim)
    key = jax.random.PRNGKey(0)
    k_eng, k_etok, k_ktoe, k_kor = jax.random.split(key, 4)
    embeddings = {
        'english': jax.random.normal(k_eng, (B, D), dtype=jnp.float32),
        'etok': jax.random.normal(k_etok, (B, D), dtype=jnp.float32),
        'ktoe': jax.random.normal(k_ktoe, (B, D), dtype=jnp.float32),
        'korean': jax.random.normal(k_kor, (B, D), dtype=jnp.float32),
    }

    total_loss, loss_dict = custom_loss(embeddings)
    jax.block_until_ready(total_loss)
    jax.block_until_ready(loss_dict['total_loss'])
    print("KERNEL_OK")
</pallas_src>

<mosaic_0001>
module attributes {stable_mosaic.version = 11 : i64} {
  func.func @_custom_loss_kernel(%arg0: memref<4x8x32xf32, #tpu.memory_space<vmem>>, %arg1: memref<1x128xf32, #tpu.memory_space<vmem>>) attributes {dimension_semantics = [], scalar_prefetch = 0 : i64, scratch_operands = 0 : i64, tpu.core_type = #tpu.core_type<tc>} {
    %c0 = arith.constant 0 : index
    %c0_0 = arith.constant 0 : index
    %c0_1 = arith.constant 0 : index
    %0 = vector.load %arg0[%c0, %c0_0, %c0_1] : memref<4x8x32xf32, #tpu.memory_space<vmem>>, vector<4x8x32xf32>
    %1 = arith.mulf %0, %0 : vector<4x8x32xf32>
    %cst = arith.constant dense<0.000000e+00> : vector<4x8xf32>
    %2 = vector.multi_reduction <add>, %1, %cst [2] : vector<4x8x32xf32> to vector<4x8xf32>
    %3 = vector.shape_cast %2 : vector<4x8xf32> to vector<4x8x1xf32>
    %cst_2 = arith.constant 1.000000e-24 : f32
    %4 = vector.broadcast %cst_2 : f32 to vector<4x8x1xf32>
    %5 = arith.maximumf %3, %4 : vector<4x8x1xf32>
    %6 = math.rsqrt %5 : vector<4x8x1xf32>
    %7 = vector.broadcast %6 : vector<4x8x1xf32> to vector<4x8x32xf32>
    %8 = arith.mulf %0, %7 : vector<4x8x32xf32>
    %9 = vector.extract_strided_slice %8 {offsets = [0, 0, 0], sizes = [1, 8, 32], strides = [1, 1, 1]} : vector<4x8x32xf32> to vector<1x8x32xf32>
    %10 = vector.shape_cast %9 : vector<1x8x32xf32> to vector<8x32xf32>
    %cst_3 = arith.constant 1.000000e+01 : f32
    %11 = vector.broadcast %cst_3 : f32 to vector<8x32xf32>
    %12 = arith.mulf %10, %11 : vector<8x32xf32>
    %13 = vector.extract_strided_slice %8 {offsets = [1, 0, 0], sizes = [3, 8, 32], strides = [1, 1, 1]} : vector<4x8x32xf32> to vector<3x8x32xf32>
    %14 = vector.shape_cast %13 : vector<3x8x32xf32> to vector<24x32xf32>
    %cst_4 = arith.constant dense<0.000000e+00> : vector<8x24xf32>
    %15 = tpu.matmul %12, %14, %cst_4 {dimension_numbers = #tpu.dot_dimension_numbers<[1], [1], [0], [0], [0, 0, 1, 0], [], []>} : vector<8x32xf32>, vector<24x32xf32>, vector<8x24xf32> -> vector<8x24xf32>
    %cst_5 = arith.constant 0.000000e+00 : f32
    %16 = vector.broadcast %cst_5 : f32 to vector<1x1xf32>
    %17 = vector.extract_strided_slice %15 {offsets = [0, 0], sizes = [8, 8], strides = [1, 1]} : vector<8x24xf32> to vector<8x8xf32>
    %18 = vector.extract_strided_slice %8 {offsets = [1, 0, 0], sizes = [1, 8, 32], strides = [1, 1, 1]} : vector<4x8x32xf32> to vector<1x8x32xf32>
    %19 = vector.shape_cast %18 : vector<1x8x32xf32> to vector<8x32xf32>
    %20 = arith.mulf %12, %19 : vector<8x32xf32>
    %cst_6 = arith.constant dense<0.000000e+00> : vector<8xf32>
    %21 = vector.multi_reduction <add>, %20, %cst_6 [1] : vector<8x32xf32> to vector<8xf32>
    %22 = vector.shape_cast %21 : vector<8xf32> to vector<8x1xf32>
    %cst_7 = arith.constant dense<0xFF800000> : vector<8xf32>
    %23 = vector.multi_reduction <maximumf>, %17, %cst_7 [1] : vector<8x8xf32> to vector<8xf32>
    %24 = vector.shape_cast %23 : vector<8xf32> to vector<8x1xf32>
    %25 = vector.broadcast %24 : vector<8x1xf32> to vector<8x8xf32>
    %26 = arith.subf %17, %25 : vector<8x8xf32>
    %27 = math.exp %26 : vector<8x8xf32>
    %cst_8 = arith.constant dense<0.000000e+00> : vector<8xf32>
    %28 = vector.multi_reduction <add>, %27, %cst_8 [1] : vector<8x8xf32> to vector<8xf32>
    %29 = vector.shape_cast %28 : vector<8xf32> to vector<8x1xf32>
    %30 = math.log %29 : vector<8x1xf32>
    %31 = arith.addf %30, %24 : vector<8x1xf32>
    %32 = arith.subf %31, %22 : vector<8x1xf32>
    %33 = vector.shape_cast %32 : vector<8x1xf32> to vector<1x8x1xf32>
    %cst_9 = arith.constant dense<0.000000e+00> : vector<1xf32>
    %34 = vector.multi_reduction <add>, %33, %cst_9 [1, 2] : vector<1x8x1xf32> to vector<1xf32>
    %35 = vector.shape_cast %34 : vector<1xf32> to vector<1x1x1xf32>
    %36 = vector.extract %35[0, 0, 0] : f32 from vector<1x1x1xf32>
    %37 = vector.broadcast %36 : f32 to vector<1x1xf32>
    %cst_10 = arith.constant 8.000000e+00 : f32
    %38 = vector.broadcast %cst_10 : f32 to vector<1x1xf32>
    %39 = arith.divf %37, %38 : vector<1x1xf32>
    %40 = arith.addf %16, %39 : vector<1x1xf32>
    %41 = vector.extract_strided_slice %15 {offsets = [0, 8], sizes = [8, 8], strides = [1, 1]} : vector<8x24xf32> to vector<8x8xf32>
    %42 = vector.extract_strided_slice %8 {offsets = [2, 0, 0], sizes = [1, 8, 32], strides = [1, 1, 1]} : vector<4x8x32xf32> to vector<1x8x32xf32>
    %43 = vector.shape_cast %42 : vector<1x8x32xf32> to vector<8x32xf32>
    %44 = arith.mulf %12, %43 : vector<8x32xf32>
    %cst_11 = arith.constant dense<0.000000e+00> : vector<8xf32>
    %45 = vector.multi_reduction <add>, %44, %cst_11 [1] : vector<8x32xf32> to vector<8xf32>
    %46 = vector.shape_cast %45 : vector<8xf32> to vector<8x1xf32>
    %cst_12 = arith.constant dense<0xFF800000> : vector<8xf32>
    %47 = vector.multi_reduction <maximumf>, %41, %cst_12 [1] : vector<8x8xf32> to vector<8xf32>
    %48 = vector.shape_cast %47 : vector<8xf32> to vector<8x1xf32>
    %49 = vector.broadcast %48 : vector<8x1xf32> to vector<8x8xf32>
    %50 = arith.subf %41, %49 : vector<8x8xf32>
    %51 = math.exp %50 : vector<8x8xf32>
    %cst_13 = arith.constant dense<0.000000e+00> : vector<8xf32>
    %52 = vector.multi_reduction <add>, %51, %cst_13 [1] : vector<8x8xf32> to vector<8xf32>
    %53 = vector.shape_cast %52 : vector<8xf32> to vector<8x1xf32>
    %54 = math.log %53 : vector<8x1xf32>
    %55 = arith.addf %54, %48 : vector<8x1xf32>
    %56 = arith.subf %55, %46 : vector<8x1xf32>
    %57 = vector.shape_cast %56 : vector<8x1xf32> to vector<1x8x1xf32>
    %cst_14 = arith.constant dense<0.000000e+00> : vector<1xf32>
    %58 = vector.multi_reduction <add>, %57, %cst_14 [1, 2] : vector<1x8x1xf32> to vector<1xf32>
    %59 = vector.shape_cast %58 : vector<1xf32> to vector<1x1x1xf32>
    %60 = vector.extract %59[0, 0, 0] : f32 from vector<1x1x1xf32>
    %61 = vector.broadcast %60 : f32 to vector<1x1xf32>
    %cst_15 = arith.constant 8.000000e+00 : f32
    %62 = vector.broadcast %cst_15 : f32 to vector<1x1xf32>
    %63 = arith.divf %61, %62 : vector<1x1xf32>
    %64 = arith.addf %40, %63 : vector<1x1xf32>
    %65 = vector.extract_strided_slice %15 {offsets = [0, 16], sizes = [8, 8], strides = [1, 1]} : vector<8x24xf32> to vector<8x8xf32>
    %66 = vector.extract_strided_slice %8 {offsets = [3, 0, 0], sizes = [1, 8, 32], strides = [1, 1, 1]} : vector<4x8x32xf32> to vector<1x8x32xf32>
    %67 = vector.shape_cast %66 : vector<1x8x32xf32> to vector<8x32xf32>
    %68 = arith.mulf %12, %67 : vector<8x32xf32>
    %cst_16 = arith.constant dense<0.000000e+00> : vector<8xf32>
    %69 = vector.multi_reduction <add>, %68, %cst_16 [1] : vector<8x32xf32> to vector<8xf32>
    %70 = vector.shape_cast %69 : vector<8xf32> to vector<8x1xf32>
    %cst_17 = arith.constant dense<0xFF800000> : vector<8xf32>
    %71 = vector.multi_reduction <maximumf>, %65, %cst_17 [1] : vector<8x8xf32> to vector<8xf32>
    %72 = vector.shape_cast %71 : vector<8xf32> to vector<8x1xf32>
    %73 = vector.broadcast %72 : vector<8x1xf32> to vector<8x8xf32>
    %74 = arith.subf %65, %73 : vector<8x8xf32>
    %75 = math.exp %74 : vector<8x8xf32>
    %cst_18 = arith.constant dense<0.000000e+00> : vector<8xf32>
    %76 = vector.multi_reduction <add>, %75, %cst_18 [1] : vector<8x8xf32> to vector<8xf32>
    %77 = vector.shape_cast %76 : vector<8xf32> to vector<8x1xf32>
    %78 = math.log %77 : vector<8x1xf32>
    %79 = arith.addf %78, %72 : vector<8x1xf32>
    %80 = arith.subf %79, %70 : vector<8x1xf32>
    %81 = vector.shape_cast %80 : vector<8x1xf32> to vector<1x8x1xf32>
    %cst_19 = arith.constant dense<0.000000e+00> : vector<1xf32>
    %82 = vector.multi_reduction <add>, %81, %cst_19 [1, 2] : vector<1x8x1xf32> to vector<1xf32>
    %83 = vector.shape_cast %82 : vector<1xf32> to vector<1x1x1xf32>
    %84 = vector.extract %83[0, 0, 0] : f32 from vector<1x1x1xf32>
    %85 = vector.broadcast %84 : f32 to vector<1x1xf32>
    %cst_20 = arith.constant 8.000000e+00 : f32
    %86 = vector.broadcast %cst_20 : f32 to vector<1x1xf32>
    %87 = arith.divf %85, %86 : vector<1x1xf32>
    %88 = arith.addf %64, %87 : vector<1x1xf32>
    %cst_21 = arith.constant 0.000000e+00 : f32
    %89 = vector.broadcast %cst_21 : f32 to vector<1x1xf32>
    %90 = vector.extract_strided_slice %8 {offsets = [0, 0, 0], sizes = [1, 8, 32], strides = [1, 1, 1]} : vector<4x8x32xf32> to vector<1x8x32xf32>
    %91 = vector.shape_cast %90 : vector<1x8x32xf32> to vector<8x32xf32>
    %cst_22 = arith.constant dense<0.000000e+00> : vector<32xf32>
    %92 = vector.multi_reduction <add>, %91, %cst_22 [0] : vector<8x32xf32> to vector<32xf32>
    %93 = vector.shape_cast %92 : vector<32xf32> to vector<1x32xf32>
    %cst_23 = arith.constant 8.000000e+00 : f32
    %94 = vector.broadcast %cst_23 : f32 to vector<1x32xf32>
    %95 = arith.divf %93, %94 : vector<1x32xf32>
    %96 = vector.extract_strided_slice %0 {offsets = [0, 0, 0], sizes = [1, 8, 32], strides = [1, 1, 1]} : vector<4x8x32xf32> to vector<1x8x32xf32>
    %97 = vector.shape_cast %96 : vector<1x8x32xf32> to vector<8x32xf32>
    %98 = vector.broadcast %95 : vector<1x32xf32> to vector<8x32xf32>
    %99 = arith.subf %97, %98 : vector<8x32xf32>
    %100 = arith.mulf %99, %99 : vector<8x32xf32>
    %cst_24 = arith.constant dense<0.000000e+00> : vector<8xf32>
    %101 = vector.multi_reduction <add>, %100, %cst_24 [1] : vector<8x32xf32> to vector<8xf32>
    %102 = vector.shape_cast %101 : vector<8xf32> to vector<8x1xf32>
    %103 = math.sqrt %102 : vector<8x1xf32>
    %104 = vector.shape_cast %103 : vector<8x1xf32> to vector<1x8x1xf32>
    %cst_25 = arith.constant dense<0.000000e+00> : vector<1xf32>
    %105 = vector.multi_reduction <add>, %104, %cst_25 [1, 2] : vector<1x8x1xf32> to vector<1xf32>
    %106 = vector.shape_cast %105 : vector<1xf32> to vector<1x1x1xf32>
    %107 = vector.extract %106[0, 0, 0] : f32 from vector<1x1x1xf32>
    %108 = vector.broadcast %107 : f32 to vector<1x1xf32>
    %cst_26 = arith.constant 8.000000e+00 : f32
    %109 = vector.broadcast %cst_26 : f32 to vector<1x1xf32>
    %110 = arith.divf %108, %109 : vector<1x1xf32>
    %111 = arith.addf %89, %110 : vector<1x1xf32>
    %112 = vector.extract_strided_slice %8 {offsets = [1, 0, 0], sizes = [1, 8, 32], strides = [1, 1, 1]} : vector<4x8x32xf32> to vector<1x8x32xf32>
    %113 = vector.shape_cast %112 : vector<1x8x32xf32> to vector<8x32xf32>
    %cst_27 = arith.constant dense<0.000000e+00> : vector<32xf32>
    %114 = vector.multi_reduction <add>, %113, %cst_27 [0] : vector<8x32xf32> to vector<32xf32>
    %115 = vector.shape_cast %114 : vector<32xf32> to vector<1x32xf32>
    %cst_28 = arith.constant 8.000000e+00 : f32
    %116 = vector.broadcast %cst_28 : f32 to vector<1x32xf32>
    %117 = arith.divf %115, %116 : vector<1x32xf32>
    %118 = vector.extract_strided_slice %0 {offsets = [1, 0, 0], sizes = [1, 8, 32], strides = [1, 1, 1]} : vector<4x8x32xf32> to vector<1x8x32xf32>
    %119 = vector.shape_cast %118 : vector<1x8x32xf32> to vector<8x32xf32>
    %120 = vector.broadcast %117 : vector<1x32xf32> to vector<8x32xf32>
    %121 = arith.subf %119, %120 : vector<8x32xf32>
    %122 = arith.mulf %121, %121 : vector<8x32xf32>
    %cst_29 = arith.constant dense<0.000000e+00> : vector<8xf32>
    %123 = vector.multi_reduction <add>, %122, %cst_29 [1] : vector<8x32xf32> to vector<8xf32>
    %124 = vector.shape_cast %123 : vector<8xf32> to vector<8x1xf32>
    %125 = math.sqrt %124 : vector<8x1xf32>
    %126 = vector.shape_cast %125 : vector<8x1xf32> to vector<1x8x1xf32>
    %cst_30 = arith.constant dense<0.000000e+00> : vector<1xf32>
    %127 = vector.multi_reduction <add>, %126, %cst_30 [1, 2] : vector<1x8x1xf32> to vector<1xf32>
    %128 = vector.shape_cast %127 : vector<1xf32> to vector<1x1x1xf32>
    %129 = vector.extract %128[0, 0, 0] : f32 from vector<1x1x1xf32>
    %130 = vector.broadcast %129 : f32 to vector<1x1xf32>
    %cst_31 = arith.constant 8.000000e+00 : f32
    %131 = vector.broadcast %cst_31 : f32 to vector<1x1xf32>
    %132 = arith.divf %130, %131 : vector<1x1xf32>
    %133 = arith.addf %111, %132 : vector<1x1xf32>
    %134 = vector.extract_strided_slice %8 {offsets = [2, 0, 0], sizes = [1, 8, 32], strides = [1, 1, 1]} : vector<4x8x32xf32> to vector<1x8x32xf32>
    %135 = vector.shape_cast %134 : vector<1x8x32xf32> to vector<8x32xf32>
    %cst_32 = arith.constant dense<0.000000e+00> : vector<32xf32>
    %136 = vector.multi_reduction <add>, %135, %cst_32 [0] : vector<8x32xf32> to vector<32xf32>
    %137 = vector.shape_cast %136 : vector<32xf32> to vector<1x32xf32>
    %cst_33 = arith.constant 8.000000e+00 : f32
    %138 = vector.broadcast %cst_33 : f32 to vector<1x32xf32>
    %139 = arith.divf %137, %138 : vector<1x32xf32>
    %140 = vector.extract_strided_slice %0 {offsets = [2, 0, 0], sizes = [1, 8, 32], strides = [1, 1, 1]} : vector<4x8x32xf32> to vector<1x8x32xf32>
    %141 = vector.shape_cast %140 : vector<1x8x32xf32> to vector<8x32xf32>
    %142 = vector.broadcast %139 : vector<1x32xf32> to vector<8x32xf32>
    %143 = arith.subf %141, %142 : vector<8x32xf32>
    %144 = arith.mulf %143, %143 : vector<8x32xf32>
    %cst_34 = arith.constant dense<0.000000e+00> : vector<8xf32>
    %145 = vector.multi_reduction <add>, %144, %cst_34 [1] : vector<8x32xf32> to vector<8xf32>
    %146 = vector.shape_cast %145 : vector<8xf32> to vector<8x1xf32>
    %147 = math.sqrt %146 : vector<8x1xf32>
    %148 = vector.shape_cast %147 : vector<8x1xf32> to vector<1x8x1xf32>
    %cst_35 = arith.constant dense<0.000000e+00> : vector<1xf32>
    %149 = vector.multi_reduction <add>, %148, %cst_35 [1, 2] : vector<1x8x1xf32> to vector<1xf32>
    %150 = vector.shape_cast %149 : vector<1xf32> to vector<1x1x1xf32>
    %151 = vector.extract %150[0, 0, 0] : f32 from vector<1x1x1xf32>
    %152 = vector.broadcast %151 : f32 to vector<1x1xf32>
    %cst_36 = arith.constant 8.000000e+00 : f32
    %153 = vector.broadcast %cst_36 : f32 to vector<1x1xf32>
    %154 = arith.divf %152, %153 : vector<1x1xf32>
    %155 = arith.addf %133, %154 : vector<1x1xf32>
    %156 = vector.extract_strided_slice %8 {offsets = [3, 0, 0], sizes = [1, 8, 32], strides = [1, 1, 1]} : vector<4x8x32xf32> to vector<1x8x32xf32>
    %157 = vector.shape_cast %156 : vector<1x8x32xf32> to vector<8x32xf32>
    %cst_37 = arith.constant dense<0.000000e+00> : vector<32xf32>
    %158 = vector.multi_reduction <add>, %157, %cst_37 [0] : vector<8x32xf32> to vector<32xf32>
    %159 = vector.shape_cast %158 : vector<32xf32> to vector<1x32xf32>
    %cst_38 = arith.constant 8.000000e+00 : f32
    %160 = vector.broadcast %cst_38 : f32 to vector<1x32xf32>
    %161 = arith.divf %159, %160 : vector<1x32xf32>
    %162 = vector.extract_strided_slice %0 {offsets = [3, 0, 0], sizes = [1, 8, 32], strides = [1, 1, 1]} : vector<4x8x32xf32> to vector<1x8x32xf32>
    %163 = vector.shape_cast %162 : vector<1x8x32xf32> to vector<8x32xf32>
    %164 = vector.broadcast %161 : vector<1x32xf32> to vector<8x32xf32>
    %165 = arith.subf %163, %164 : vector<8x32xf32>
    %166 = arith.mulf %165, %165 : vector<8x32xf32>
    %cst_39 = arith.constant dense<0.000000e+00> : vector<8xf32>
    %167 = vector.multi_reduction <add>, %166, %cst_39 [1] : vector<8x32xf32> to vector<8xf32>
    %168 = vector.shape_cast %167 : vector<8xf32> to vector<8x1xf32>
    %169 = math.sqrt %168 : vector<8x1xf32>
    %170 = vector.shape_cast %169 : vector<8x1xf32> to vector<1x8x1xf32>
    %cst_40 = arith.constant dense<0.000000e+00> : vector<1xf32>
    %171 = vector.multi_reduction <add>, %170, %cst_40 [1, 2] : vector<1x8x1xf32> to vector<1xf32>
    %172 = vector.shape_cast %171 : vector<1xf32> to vector<1x1x1xf32>
    %173 = vector.extract %172[0, 0, 0] : f32 from vector<1x1x1xf32>
    %174 = vector.broadcast %173 : f32 to vector<1x1xf32>
    %cst_41 = arith.constant 8.000000e+00 : f32
    %175 = vector.broadcast %cst_41 : f32 to vector<1x1xf32>
    %176 = arith.divf %174, %175 : vector<1x1xf32>
    %177 = arith.addf %155, %176 : vector<1x1xf32>
    %cst_42 = arith.constant 0.000000e+00 : f32
    %178 = vector.broadcast %cst_42 : f32 to vector<1x1xf32>
    %179 = arith.subf %95, %117 : vector<1x32xf32>
    %180 = arith.mulf %179, %179 : vector<1x32xf32>
    %cst_43 = arith.constant dense<0.000000e+00> : vector<1xf32>
    %181 = vector.multi_reduction <add>, %180, %cst_43 [1] : vector<1x32xf32> to vector<1xf32>
    %182 = vector.shape_cast %181 : vector<1xf32> to vector<1x1xf32>
    %183 = math.sqrt %182 : vector<1x1xf32>
    %184 = arith.addf %178, %183 : vector<1x1xf32>
    %185 = arith.subf %95, %139 : vector<1x32xf32>
    %186 = arith.mulf %185, %185 : vector<1x32xf32>
    %cst_44 = arith.constant dense<0.000000e+00> : vector<1xf32>
    %187 = vector.multi_reduction <add>, %186, %cst_44 [1] : vector<1x32xf32> to vector<1xf32>
    %188 = vector.shape_cast %187 : vector<1xf32> to vector<1x1xf32>
    %189 = math.sqrt %188 : vector<1x1xf32>
    %190 = arith.addf %184, %189 : vector<1x1xf32>
    %191 = arith.subf %95, %161 : vector<1x32xf32>
    %192 = arith.mulf %191, %191 : vector<1x32xf32>
    %cst_45 = arith.constant dense<0.000000e+00> : vector<1xf32>
    %193 = vector.multi_reduction <add>, %192, %cst_45 [1] : vector<1x32xf32> to vector<1xf32>
    %194 = vector.shape_cast %193 : vector<1xf32> to vector<1x1xf32>
    %195 = math.sqrt %194 : vector<1x1xf32>
    %196 = arith.addf %190, %195 : vector<1x1xf32>
    %197 = arith.subf %117, %139 : vector<1x32xf32>
    %198 = arith.mulf %197, %197 : vector<1x32xf32>
    %cst_46 = arith.constant dense<0.000000e+00> : vector<1xf32>
    %199 = vector.multi_reduction <add>, %198, %cst_46 [1] : vector<1x32xf32> to vector<1xf32>
    %200 = vector.shape_cast %199 : vector<1xf32> to vector<1x1xf32>
    %201 = math.sqrt %200 : vector<1x1xf32>
    %202 = arith.addf %196, %201 : vector<1x1xf32>
    %203 = arith.subf %117, %161 : vector<1x32xf32>
    %204 = arith.mulf %203, %203 : vector<1x32xf32>
    %cst_47 = arith.constant dense<0.000000e+00> : vector<1xf32>
    %205 = vector.multi_reduction <add>, %204, %cst_47 [1] : vector<1x32xf32> to vector<1xf32>
    %206 = vector.shape_cast %205 : vector<1xf32> to vector<1x1xf32>
    %207 = math.sqrt %206 : vector<1x1xf32>
    %208 = arith.addf %202, %207 : vector<1x1xf32>
    %209 = arith.subf %139, %161 : vector<1x32xf32>
    %210 = arith.mulf %209, %209 : vector<1x32xf32>
    %cst_48 = arith.constant dense<0.000000e+00> : vector<1xf32>
    %211 = vector.multi_reduction <add>, %210, %cst_48 [1] : vector<1x32xf32> to vector<1xf32>
    %212 = vector.shape_cast %211 : vector<1xf32> to vector<1x1xf32>
    %213 = math.sqrt %212 : vector<1x1xf32>
    %214 = arith.addf %208, %213 : vector<1x1xf32>
    %cst_49 = arith.constant 0.000000e+00 : f32
    %215 = vector.broadcast %cst_49 : f32 to vector<1x1xf32>
    %216 = arith.subf %215, %214 : vector<1x1xf32>
    %cst_50 = arith.constant 6.000000e+00 : f32
    %217 = vector.broadcast %cst_50 : f32 to vector<1x1xf32>
    %218 = arith.divf %216, %217 : vector<1x1xf32>
    %219 = tpu.iota {dimensions = array<i32: 1>} : vector<1x128xi32>
    %c0_i32 = arith.constant 0 : i32
    %220 = vector.broadcast %c0_i32 : i32 to vector<1x128xi32>
    %221 = arith.cmpi eq, %219, %220 : vector<1x128xi32>
    %cst_51 = arith.constant 0.000000e+00 : f32
    %222 = vector.shape_cast %88 : vector<1x1xf32> to vector<1x1xf32>
    %223 = vector.broadcast %222 : vector<1x1xf32> to vector<1x128xf32>
    %224 = vector.broadcast %cst_51 : f32 to vector<1x128xf32>
    %225 = arith.select %221, %223, %224 : vector<1x128xi1>, vector<1x128xf32>
    %c1_i32 = arith.constant 1 : i32
    %226 = vector.broadcast %c1_i32 : i32 to vector<1x128xi32>
    %227 = arith.cmpi eq, %219, %226 : vector<1x128xi32>
    %cst_52 = arith.constant 0.000000e+00 : f32
    %228 = vector.shape_cast %177 : vector<1x1xf32> to vector<1x1xf32>
    %229 = vector.broadcast %228 : vector<1x1xf32> to vector<1x128xf32>
    %230 = vector.broadcast %cst_52 : f32 to vector<1x128xf32>
    %231 = arith.select %227, %229, %230 : vector<1x128xi1>, vector<1x128xf32>
    %232 = arith.addf %225, %231 : vector<1x128xf32>
    %c2_i32 = arith.constant 2 : i32
    %233 = vector.broadcast %c2_i32 : i32 to vector<1x128xi32>
    %234 = arith.cmpi eq, %219, %233 : vector<1x128xi32>
    %cst_53 = arith.constant 0.000000e+00 : f32
    %235 = vector.shape_cast %218 : vector<1x1xf32> to vector<1x1xf32>
    %236 = vector.broadcast %235 : vector<1x1xf32> to vector<1x128xf32>
    %237 = vector.broadcast %cst_53 : f32 to vector<1x128xf32>
    %238 = arith.select %234, %236, %237 : vector<1x128xi1>, vector<1x128xf32>
    %239 = arith.addf %232, %238 : vector<1x128xf32>
    %c0_54 = arith.constant 0 : index
    %c0_55 = arith.constant 0 : index
    %240 = vector.load %arg1[%c0_54, %c0_55] : memref<1x128xf32, #tpu.memory_space<vmem>>, vector<1x128xf32>
    tpu.vector_store %arg1[%c0_54, %c0_55], %239 {strides = array<i32>} : memref<1x128xf32, #tpu.memory_space<vmem>>, vector<1x128xf32>,
    return
  }
}

</mosaic_0001>

<bundles_post_ra>
// kernel: _custom_loss_impl.1
= control target key start
LH: loop header
LB: loop body
LE: loop exit
PB: predicated region body
PF: predicated region fallthrough
CT: control target
= control target key end

     0   :  { %6 = vsyncpa [#allocation3], 0  ;;  %s577_s6 = smov [#allocation2]   ;;  %s715_s0 = inlined_call_operand.hbm [shape: f32[4,8,32], index: 0, kind: input, shape index: {}]   ;;  %s716_s1 = inlined_call_operand.vmem [shape: f32[1,128], index: 1, kind: output, shape index: {}]  }
   0x1   :  { %s12_s7 = sshll.u32 %s577_s6, 4  ;;  %s553_s10 = scalar_lea.hbm %s715_s0, 512  ;;  %s13_s7 = int_to_ptr.vmem [resolvable:$true] %s12_s7 }
   0x2   :  { %p554_p0 = scmp.ne.s32.totalorder %s715_s0, %s553_s10  ;;  %p557_p1 = scmp.lt.u32.totalorder %s553_s10, %s715_s0 }
   0x4   :  { %p559_p2 = pnand %p557_p1, %p554_p0 }
   0x6   :  { %562 = shalt.err (!%p559_p2)
}
   0x7   :  { %s563_s15 = scalar_lea.vmem %s13_s7, 512  ;;  %p568_p4 = scmp.lt.s32.totalorder %s13_s7, %s13_s7 }
   0x8   :  { %p564_p3 = scmp.ne.s32.totalorder %s13_s7, %s563_s15  ;;  %p569_p5 = scmp.lt.s32.totalorder %s563_s15, %s563_s15 }
   0xa   :  { %p570_p6 = por %p569_p5, %p568_p4 }
   0xc   :  { %p571_p7 = pnand %p570_p6, %p564_p3 }
   0xe   :  { %574 = shalt.err (!%p571_p7)
}
   0xf   :  { %s578_s16 = smov 128   ;;  %s579_s17 = smov 8  }
  0x10   :  { %18 = dma.hbm_to_vmem [thread:$0]  %s715_s0, 512, %s13_s7, [#allocation3], %s578_s16, %s578_s16, %s579_s17  }
  0x11   :  { %575 = dma.done.wait [#allocation3], 512  }
  0x12   :  { %576 = vsyncadd [#allocation3], 4294966784  ;;  %v607_v0 = vld [vmem:[#allocation2 + $0x18] sm:$0xff]  ;;  %vm30_vm0 = vcmask 261120   ;;  %v609_v1 = vld [vmem:[#allocation2 + $0x8] sm:$0xff]  ;;  %v580_v12 = vmov 0.0|0.0  }
  0x13   :  { %v611_v2 = vld [vmem:[#allocation2 + $0x10] sm:$0xff]  ;;  %v29_v3 = vmul.f32 %v607_v0, %v607_v0  ;;  %v27_v4 = vmul.f32 %v609_v1, %v609_v1  ;;  %v619_v6 = vld [vmem:[#allocation2] sm:$0xff]  ;;  %487 = vmatprep.subr.bf16.mxu0 %v580_v12  ;;  %vm581_vm1 = vmmov 0   ;;  %v582_v13 = vmov 0.0   ;;  %vm489_vm2 = vmpackc.low %vm30_vm0, %vm30_vm0  ;;  %s583_s0 = smov 112   ;;  %s584_s20 = smov 120  }
  0x14   :  { %v28_v5 = vmul.f32 %v611_v2, %v611_v2  ;;  %v26_v7 = vmul.f32 %v619_v6, %v619_v6  ;;  %484 = vmatprep.mubr.msk.f32.mxu0 %vm581_vm1, %v582_v13  ;;  %vm210_vm3 = vcmask 195712   ;;  %vm175_vm4 = vcmask 130112  }
  0x15   :  { %v40_v8 = vsel %vm30_vm0, %v29_v3, 0.0  ;;  %v34_v9 = vsel %vm30_vm0, %v27_v4, 0.0  ;;  %vm142_vm5 = vcmask 64512   ;;  %vm156_vm6 = vcmask 7168  }
  0x16   :  { %41 = vadd.xlane.f32.xlu1 %v40_v8  ;;  %35 = vadd.xlane.f32.xlu0 %v34_v9  ;;  %v37_v10 = vsel %vm30_vm0, %v28_v5, 0.0  ;;  %v31_v11 = vsel %vm30_vm0, %v26_v7, 0.0 }
  0x1a   :  { %38 = vadd.xlane.f32.xlu0 %v37_v10  ;;  %32 = vadd.xlane.f32.xlu1 %v31_v11 }
  0xa3   :  { %v42_v14 = vpop.xlane.xlu1 %41  ;;  %v36_v15 = vpop.xlane.xlu0 %35 }
  0xa4   :  { %v46_v16 = vmax.f32 %v42_v14, 1e-24  ;;  %v44_v17 = vmax.f32 %v36_v15, 1e-24 }
  0xa6   :  { %513 = vrsqrt.f32 %v46_v16 }
  0xa7   :  { %515 = vrsqrt.f32 %v44_v17  ;;  %v39_v18 = vpop.xlane.xlu0 %38  ;;  %v33_v19 = vpop.xlane.xlu1 %32 }
  0xa8   :  { %v45_v20 = vmax.f32 %v39_v18, 1e-24  ;;  %v43_v21 = vmax.f32 %v33_v19, 1e-24 }
  0xaa   :  { %517 = vrsqrt.f32 %v45_v20 }
  0xab   :  { %519 = vrsqrt.f32 %v43_v21 }
  0xb0   :  { %v514_v22 = vpop.eup %513 }
  0xb1   :  { %v516_v23 = vpop.eup %515  ;;  %v54_v24 = vmul.f32 %v514_v22, %v607_v0 }
  0xb2   :  { %v52_v25 = vmul.f32 %v516_v23, %v609_v1 }
  0xb3   :  { %v340_v26 = vsel %vm30_vm0, %v54_v24, 0.0 }
  0xb4   :  { %v518_v27 = vpop.eup %517  ;;  %v274_v28 = vsel %vm30_vm0, %v52_v25, 0.0  ;;  %v341_v29 = vrot.slane %v340_v26, 4 }
  0xb5   :  { %v520_v30 = vpop.eup %519  ;;  %v53_v31 = vmul.f32 %v518_v27, %v611_v2  ;;  %v275_v32 = vrot.slane %v274_v28, 4 }
  0xb6   :  { %v342_v33 = vadd.f32 %v341_v29, %v340_v26  ;;  %v51_v34 = vmul.f32 %v520_v30, %v619_v6 }
  0xb7   :  { %v488_v35 = vpack.c.bf16 %v53_v31, %v52_v25  ;;  %v276_v36 = vadd.f32 %v275_v32, %v274_v28  ;;  %v307_v37 = vsel %vm30_vm0, %v53_v31, 0.0 }
  0xb8   :  { %v308_v38 = vrot.slane %v307_v37, 4  ;;  %v343_v39 = vrot.slane %v342_v33, 2  ;;  %v55_v40 = vmul.f32 10.0, %v51_v34  ;;  %v241_v41 = vsel %vm30_vm0, %v51_v34, 0.0 }
  0xb9   :  { %490 = vmatpush3.bf16.xpose.msk.msra.mxu0 %vm489_vm2, %v488_v35  ;;  %v242_v42 = vrot.slane %v241_v41, 4  ;;  %v277_v43 = vrot.slane %v276_v36, 2 }
  0xba   :  { %v309_v44 = vadd.f32 %v308_v38, %v307_v37  ;;  %482 = vmatprep.subr.mxu0 %v582_v13  ;;  %v637_v45 = vmul.f32 %v55_v40, %v52_v25  ;;  %v344_v46 = vadd.f32 %v343_v39, %v342_v33  ;;  %v639_v47 = vmul.f32 %v55_v40, %v54_v24 }
  0xbb   :  { %v243_v48 = vadd.f32 %v242_v42, %v241_v41  ;;  %v278_v49 = vadd.f32 %v277_v43, %v276_v36  ;;  %v641_v50 = vmul.f32 %v55_v40, %v53_v31 }
  0xbc   :  { %v310_v51 = vrot.slane %v309_v44, 2  ;;  %v345_v52 = vrot.slane %v344_v46, 1 }
  0xbd   :  { %v244_v53 = vrot.slane %v243_v48, 2  ;;  %v279_v54 = vrot.slane %v278_v49, 1 }
  0xbe   :  { %v311_v55 = vadd.f32 %v310_v51, %v309_v44  ;;  %v346_v56 = vadd.f32 %v345_v52, %v344_v46  ;;  %v207_v46 = vsel %vm30_vm0, %v639_v47, 0.0 }
  0xbf   :  { %v245_v57 = vadd.f32 %v244_v53, %v243_v48  ;;  %v280_v58 = vadd.f32 %v279_v54, %v278_v49 }
  0xc0   :  { %v312_v59 = vrot.slane %v311_v55, 1  ;;  %v347_v60 = vmul.f32 0.125, %v346_v56 }
  0xc1   :  { %483 = vmatpush3.xpose.msk.msra.mxu0 %vm30_vm0, %v54_v24  ;;  %v246_v61 = vrot.slane %v245_v57, 1  ;;  %v281_v62 = vmul.f32 0.125, %v280_v58 }
  0xc2   :  { %v313_v63 = vadd.f32 %v312_v59, %v311_v55 }
  0xc3   :  { %v247_v3 = vadd.f32 %v246_v61, %v245_v57  ;;  %v644_v4 = vsub.f32 %v281_v62, %v347_v60  ;;  %v282_v34 = vsub.f32 %v609_v1, %v281_v62 }
  0xc4   :  { %485 = vmatmul.mubr.msk.f32.vlgmr.msra.gmra.mrb[0].mxu0 %vm30_vm0, %v55_v40  ;;  %v314_v5 = vmul.f32 0.125, %v313_v63 }
  0xc5   :  { %v248_v7 = vmul.f32 0.125, %v247_v3  ;;  %v283_v39 = vmul.f32 %v282_v34, %v282_v34 }
  0xc6   :  { %v647_v8 = vsub.f32 %v281_v62, %v314_v5  ;;  %v649_v9 = vsub.f32 %v314_v5, %v347_v60  ;;  %v315_v35 = vsub.f32 %v611_v2, %v314_v5  ;;  %v139_v2 = vsel %vm30_vm0, %v637_v45, 0.0 }
  0xc7   :  { %v651_v10 = vsub.f32 %v248_v7, %v281_v62  ;;  %v653_v11 = vsub.f32 %v248_v7, %v347_v60  ;;  %v655_v12 = vsub.f32 %v248_v7, %v314_v5  ;;  %v249_v29 = vsub.f32 %v619_v6, %v248_v7 }
  0xc8   :  { %v348_v6 = vsub.f32 %v607_v0, %v347_v60  ;;  %v316_v41 = vmul.f32 %v315_v35, %v315_v35  ;;  %v284_v42 = vsel %vm30_vm0, %v283_v39, 0.0  ;;  %v172_v0 = vsel %vm30_vm0, %v641_v50, 0.0 }
  0xc9   :  { %v250_v30 = vmul.f32 %v249_v29, %v249_v29  ;;  %v374_v35 = vmul.f32 %v651_v10, %v651_v10  ;;  %v400_v39 = vmul.f32 %v653_v11, %v653_v11 }
  0xca   :  { %v349_v43 = vmul.f32 %v348_v6, %v348_v6  ;;  %v317_v44 = vsel %vm30_vm0, %v316_v41, 0.0 }
  0xcb   :  { %v251_v31 = vsel %vm30_vm0, %v250_v30, 0.0  ;;  %v401_v10 = vsel %vm30_vm0, %v400_v39, 0.0 }
  0xcc   :  { %v350_v1 = vsel %vm30_vm0, %v349_v43, 0.0 }
 0x197   :  { %v134_v13 = vpop.f32.mrb[0].mxu0 }
 0x198   :  { %v486_v14 = vpop.f32.mrb[1].mxu0  ;;  %v211_v15 = vsel %vm210_vm3, %v134_v13, -inf  ;;  %v176_v16 = vsel %vm175_vm4, %v134_v13, -inf  ;;  %v143_v17 = vsel %vm142_vm5, %v134_v13, -inf }
 0x199   :  { %212 = vmax.xlane.f32.xlu1 %v211_v15  ;;  %177 = vmax.xlane.f32.xlu0 %v176_v16 }
 0x19d   :  { %144 = vmax.xlane.f32.xlu0 %v143_v17 }
 0x226   :  { %v658_v18 = vpop.xlane.xlu1 %212  ;;  %v660_v19 = vpop.xlane.xlu0 %177 }
 0x227   :  { %v214_v20 = vsub.f32 %v134_v13, %v658_v18  ;;  %v179_v21 = vsub.f32 %v134_v13, %v660_v19 }
 0x229   :  { %v215_v22 = vmul.f32 1.442695, %v214_v20  ;;  %v180_v23 = vmul.f32 1.442695, %v179_v21 }
 0x22a   :  { %v664_v26 = vpop.xlane.xlu0 %144 }
 0x22b   :  { %521 = vpow2.f32 %v215_v22  ;;  %v146_v27 = vsub.f32 %v134_v13, %v664_v26 }
 0x22c   :  { %523 = vpow2.f32 %v180_v23 }
 0x22d   :  { %v147_v28 = vmul.f32 1.442695, %v146_v27 }
 0x22f   :  { %525 = vpow2.f32 %v147_v28 }
 0x235   :  { %v522_v24 = vpop.eup %521 }
 0x236   :  { %v524_v25 = vpop.eup %523  ;;  %218 = vrot.lane.b32.xlu0 %v522_v24, %s583_s0 }
 0x237   :  { %183 = vrot.lane.b32.xlu1 %v524_v25, %s584_s20 }
 0x239   :  { %v526_v32 = vpop.eup %525 }
 0x23a   :  { %v149_v33 = vsel %vm142_vm5, %v526_v32, 0.0 }
 0x255   :  { %252 = vadd.xlane.f32.xlu0 %v251_v31 }
 0x25b   :  { %150 = vadd.xlane.f32.xlu1 %v149_v33 }
 0x2a8   :  { %v219_v36 = vpop.permute.xlu0 %218 }
 0x2a9   :  { %v184_v37 = vpop.permute.xlu1 %183  ;;  %v221_v38 = vsel %vm142_vm5, %v219_v36, 0.0 }
 0x2aa   :  { %v186_v40 = vsel %vm142_vm5, %v184_v37, 0.0  ;;  %222 = vadd.xlane.f32.xlu1 %v221_v38 }
 0x2ab   :  { %187 = vadd.xlane.f32.xlu0 %v186_v40 }
 0x2ae   :  { %285 = vadd.xlane.f32.xlu1 %v284_v42  ;;  %v426_v42 = vmul.f32 %v644_v4, %v644_v4  ;;  %v439_v4 = vmul.f32 %v649_v9, %v649_v9 }
 0x2af   :  { %318 = vadd.xlane.f32.xlu0 %v317_v44  ;;  %v387_v44 = vmul.f32 %v655_v12, %v655_v12 }
 0x2b0   :  { %v427_v11 = vsel %vm30_vm0, %v426_v42, 0.0 }
 0x2b2   :  { %351 = vadd.xlane.f32.xlu1 %v350_v1  ;;  %v388_v1 = vsel %vm30_vm0, %v387_v44, 0.0 }
 0x2b3   :  { %140 = vadd.xlane.f32.xlu0 %v139_v2  ;;  %v413_v2 = vmul.f32 %v647_v8, %v647_v8 }
 0x2b6   :  { %173 = vadd.xlane.f32.xlu1 %v172_v0  ;;  %v414_v0 = vsel %vm30_vm0, %v413_v2, 0.0 }
 0x2b7   :  { %208 = vadd.xlane.f32.xlu0 %v207_v46  ;;  %v440_v46 = vsel %vm30_vm0, %v439_v4, 0.0 }
 0x2e2   :  { %v253_v48 = vpop.xlane.xlu0 %252 }
 0x2e3   :  { %527 = vrsqrt.f32 %v253_v48  ;;  %vm256_vm7 = vcmp.eq.f32.partialorder %v253_v48, inf  ;;  %v259_v52 = vand.u32 2147483648, %v253_v48  ;;  %vm258_vm8 = vcmp.eq.f32.partialorder %v253_v48, 0.0 }
 0x2e8   :  { %v151_v55 = vpop.xlane.xlu1 %150 }
 0x2e9   :  { %529 = vlog2.f32 %v151_v55 }
 0x2ed   :  { %v528_v49 = vpop.eup %527 }
 0x2ee   :  { %v255_v51 = vmul.f32 %v528_v49, %v253_v48 }
 0x2f0   :  { %v257_v53 = vsel %vm256_vm7, %v253_v48, %v255_v51 }
 0x2f1   :  { %v260_v45 = vsel %vm258_vm8, %v259_v52, %v257_v53 }
 0x2f2   :  { %v261_v54 = vsel %vm156_vm6, %v260_v45, 0.0 }
 0x2f3   :  { %262 = vadd.xlane.f32.xlu0 %v261_v54  ;;  %v530_v59 = vpop.eup %529 }
 0x2f4   :  { %v153_v61 = vmul.f32 0.6931472, %v530_v59 }
 0x2f6   :  { %v154_v14 = vadd.f32 %v153_v61, %v664_v26 }
 0x337   :  { %v223_v50 = vpop.xlane.xlu1 %222 }
 0x338   :  { %v188_v56 = vpop.xlane.xlu0 %187 }
 0x339   :  { %531 = vlog2.f32 %v188_v56 }
 0x33a   :  { %533 = vlog2.f32 %v223_v50 }
 0x33b   :  { %v286_v47 = vpop.xlane.xlu1 %285 }
 0x33c   :  { %535 = vrsqrt.f32 %v286_v47  ;;  %v319_v57 = vpop.xlane.xlu0 %318  ;;  %vm289_vm9 = vcmp.eq.f32.partialorder %v286_v47, inf  ;;  %v292_v21 = vand.u32 2147483648, %v286_v47  ;;  %vm291_vm10 = vcmp.eq.f32.partialorder %v286_v47, 0.0 }
 0x33d   :  { %537 = vrsqrt.f32 %v319_v57  ;;  %vm322_vm11 = vcmp.eq.f32.partialorder %v319_v57, inf  ;;  %v325_v24 = vand.u32 2147483648, %v319_v57  ;;  %vm324_vm12 = vcmp.eq.f32.partialorder %v319_v57, 0.0 }
 0x33f   :  { %v352_v58 = vpop.xlane.xlu1 %351 }
 0x340   :  { %539 = vrsqrt.f32 %v352_v58  ;;  %v141_v17 = vpop.xlane.xlu0 %140  ;;  %vm355_vm13 = vcmp.eq.f32.partialorder %v352_v58, inf  ;;  %v358_v6 = vand.u32 2147483648, %v352_v58  ;;  %vm357_vm14 = vcmp.eq.f32.partialorder %v352_v58, 0.0 }
 0x341   :  { %v155_v29 = vsub.f32 %v154_v14, %v141_v17 }
 0x343   :  { %v532_v60 = vpop.eup %531  ;;  %v174_v15 = vpop.xlane.xlu1 %173  ;;  %v157_v37 = vsel %vm156_vm6, %v155_v29, 0.0 }
 0x344   :  { %v534_v62 = vpop.eup %533  ;;  %v190_v63 = vmul.f32 0.6931472, %v532_v60  ;;  %v209_v33 = vpop.xlane.xlu0 %208 }
 0x345   :  { %v225_v13 = vmul.f32 0.6931472, %v534_v62 }
 0x346   :  { %v536_v3 = vpop.eup %535  ;;  %v191_v5 = vadd.f32 %v190_v63, %v660_v19 }
 0x347   :  { %v538_v7 = vpop.eup %537  ;;  %v288_v16 = vmul.f32 %v536_v3, %v286_v47  ;;  %v226_v26 = vadd.f32 %v225_v13, %v658_v18  ;;  %v375_v18 = vsel %vm30_vm0, %v374_v35, 0.0 }
 0x348   :  { %v192_v20 = vsub.f32 %v191_v5, %v174_v15  ;;  %v321_v22 = vmul.f32 %v538_v7, %v319_v57 }
 0x349   :  { %v290_v23 = vsel %vm289_vm9, %v286_v47, %v288_v16  ;;  %v227_v36 = vsub.f32 %v226_v26, %v209_v33 }
 0x34a   :  { %v540_v25 = vpop.eup %539  ;;  %v193_v27 = vsel %vm156_vm6, %v192_v20, 0.0  ;;  %v293_v28 = vsel %vm291_vm10, %v292_v21, %v290_v23  ;;  %v323_v19 = vsel %vm322_vm11, %v319_v57, %v321_v22 }
 0x34b   :  { %194 = vadd.xlane.f32.xlu0 %v193_v27  ;;  %v294_v30 = vsel %vm156_vm6, %v293_v28, 0.0  ;;  %v326_v31 = vsel %vm324_vm12, %v325_v24, %v323_v19  ;;  %v354_v32 = vmul.f32 %v540_v25, %v352_v58  ;;  %v228_v40 = vsel %vm156_vm6, %v227_v36, 0.0 }
 0x34c   :  { %295 = vadd.xlane.f32.xlu1 %v294_v30  ;;  %v327_v34 = vsel %vm156_vm6, %v326_v31, 0.0 }
 0x34d   :  { %v356_v38 = vsel %vm355_vm13, %v352_v58, %v354_v32 }
 0x34e   :  { %v359_v41 = vsel %vm357_vm14, %v358_v6, %v356_v38 }
 0x34f   :  { %328 = vadd.xlane.f32.xlu0 %v327_v34  ;;  %v360_v43 = vsel %vm156_vm6, %v359_v41, 0.0 }
 0x350   :  { %158 = vadd.xlane.f32.xlu1 %v157_v37 }
 0x353   :  { %376 = vadd.xlane.f32.xlu0 %v375_v18 }
 0x354   :  { %229 = vadd.xlane.f32.xlu1 %v228_v40 }
 0x357   :  { %402 = vadd.xlane.f32.xlu0 %v401_v10 }
 0x358   :  { %361 = vadd.xlane.f32.xlu1 %v360_v43 }
 0x35b   :  { %428 = vadd.xlane.f32.xlu0 %v427_v11 }
 0x35c   :  { %389 = vadd.xlane.f32.xlu1 %v388_v1 }
 0x360   :  { %415 = vadd.xlane.f32.xlu1 %v414_v0 }
 0x364   :  { %441 = vadd.xlane.f32.xlu1 %v440_v46 }
 0x380   :  { %v263_v12 = vpop.xlane.xlu0 %262 }
 0x381   :  { %v264_v52 = vrot.slane %v263_v12, 4 }
 0x383   :  { %v265_v56 = vadd.f32 %v264_v52, %v263_v12 }
 0x385   :  { %v266_v61 = vrot.slane %v265_v56, 2 }
 0x387   :  { %v267_v21 = vadd.f32 %v266_v61, %v265_v56 }
 0x389   :  { %v268_v29 = vrot.slane %v267_v21, 1 }
 0x38b   :  { %v269_v34 = vadd.f32 %v268_v29, %v267_v21 }
 0x3d8   :  { %v195_v48 = vpop.xlane.xlu0 %194 }
 0x3d9   :  { %v196_v49 = vrot.slane %v195_v48, 4  ;;  %v296_v51 = vpop.xlane.xlu1 %295 }
 0x3da   :  { %v297_v45 = vrot.slane %v296_v51, 4 }
 0x3db   :  { %v197_v53 = vadd.f32 %v196_v49, %v195_v48 }
 0x3dc   :  { %v329_v54 = vpop.xlane.xlu0 %328  ;;  %v298_v57 = vadd.f32 %v297_v45, %v296_v51 }
 0x3dd   :  { %v198_v55 = vrot.slane %v197_v53, 2  ;;  %v330_v8 = vrot.slane %v329_v54, 4  ;;  %v159_v50 = vpop.xlane.xlu1 %158 }
 0x3de   :  { %v160_v47 = vrot.slane %v159_v50, 4  ;;  %v299_v3 = vrot.slane %v298_v57, 2 }
 0x3df   :  { %v331_v58 = vadd.f32 %v330_v8, %v329_v54  ;;  %v199_v60 = vadd.f32 %v198_v55, %v197_v53 }
 0x3e0   :  { %v161_v9 = vadd.f32 %v160_v47, %v159_v50  ;;  %v300_v22 = vadd.f32 %v299_v3, %v298_v57  ;;  %v377_v18 = vpop.xlane.xlu0 %376 }
 0x3e1   :  { %v230_v59 = vpop.xlane.xlu1 %229  ;;  %v332_v5 = vrot.slane %v331_v58, 2  ;;  %v200_v15 = vrot.slane %v199_v60, 1  ;;  %vm380_vm0 = vcmp.eq.f32.partialorder %v377_v18, inf  ;;  %v383_v48 = vand.u32 2147483648, %v377_v18 }
 0x3e2   :  { %v162_v62 = vrot.slane %v161_v9, 2  ;;  %v231_v63 = vrot.slane %v230_v59, 4  ;;  %v301_v30 = vrot.slane %v300_v22, 1  ;;  %vm382_vm2 = vcmp.eq.f32.partialorder %v377_v18, 0.0 }
 0x3e3   :  { %v333_v27 = vadd.f32 %v332_v5, %v331_v58  ;;  %v201_v28 = vadd.f32 %v200_v15, %v199_v60 }
 0x3e4   :  { %v232_v7 = vadd.f32 %v231_v63, %v230_v59  ;;  %v163_v13 = vadd.f32 %v162_v62, %v161_v9  ;;  %v302_v35 = vadd.f32 %v301_v30, %v300_v22  ;;  %v403_v6 = vpop.xlane.xlu0 %402 }
 0x3e5   :  { %v362_v14 = vpop.xlane.xlu1 %361  ;;  %v334_v31 = vrot.slane %v333_v27, 1  ;;  %vm406_vm3 = vcmp.eq.f32.partialorder %v403_v6, inf  ;;  %v409_v55 = vand.u32 2147483648, %v403_v6  ;;  %vm408_vm5 = vcmp.eq.f32.partialorder %v403_v6, 0.0 }
 0x3e6   :  { %v233_v16 = vrot.slane %v232_v7, 2  ;;  %v363_v17 = vrot.slane %v362_v14, 4  ;;  %v164_v20 = vrot.slane %v163_v13, 1 }
 0x3e7   :  { %v335_v37 = vadd.f32 %v334_v31, %v333_v27 }
 0x3e8   :  { %v364_v23 = vadd.f32 %v363_v17, %v362_v14  ;;  %v165_v24 = vadd.f32 %v164_v20, %v163_v13  ;;  %v234_v25 = vadd.f32 %v233_v16, %v232_v7  ;;  %v429_v10 = vpop.xlane.xlu0 %428 }
 0x3e9   :  { %v390_v39 = vpop.xlane.xlu1 %389  ;;  %vm432_vm7 = vcmp.eq.f32.partialorder %v429_v10, inf  ;;  %v435_v62 = vand.u32 2147483648, %v429_v10  ;;  %vm434_vm9 = vcmp.eq.f32.partialorder %v429_v10, 0.0 }
 0x3ea   :  { %v365_v19 = vrot.slane %v364_v23, 2  ;;  %491 = vpush %v165_v24  ;;  %v235_v26 = vrot.slane %v234_v25, 1  ;;  %541 = vrsqrt.f32 %v390_v39  ;;  %vm393_vm15 = vcmp.eq.f32.partialorder %v390_v39, inf }
 0x3eb   :  { %493 = vpush %v201_v28  ;;  %543 = vrsqrt.f32 %v377_v18  ;;  %v396_v4 = vand.u32 2147483648, %v390_v39  ;;  %vm395_vm1 = vcmp.eq.f32.partialorder %v390_v39, 0.0 }
 0x3ec   :  { %v366_v32 = vadd.f32 %v365_v19, %v364_v23  ;;  %v236_v33 = vadd.f32 %v235_v26, %v234_v25  ;;  %545 = vrsqrt.f32 %v403_v6  ;;  %v454_v23 = vlaneseq }
 0x3ed   :  { %v416_v40 = vpop.xlane.xlu1 %415 }
 0x3ee   :  { %495 = vpush %v236_v33  ;;  %v367_v36 = vrot.slane %v366_v32, 1  ;;  %547 = vrsqrt.f32 %v416_v40  ;;  %vm419_vm4 = vcmp.eq.f32.partialorder %v416_v40, inf  ;;  %v422_v47 = vand.u32 2147483648, %v416_v40 }
 0x3ef   :  { %497 = vpush %v269_v34  ;;  %549 = vrsqrt.f32 %v429_v10  ;;  %vm421_vm6 = vcmp.eq.f32.partialorder %v416_v40, 0.0  ;;  %v455_v34 = vand.u32 127, %v454_v23 }
 0x3f0   :  { %499 = vpush %v302_v35  ;;  %v368_v38 = vadd.f32 %v367_v36, %v366_v32 }
 0x3f1   :  { %501 = vpush %v335_v37  ;;  %v442_v44 = vpop.xlane.xlu1 %441  ;;  %vm456_vm11 = vcmp.eq.s32.totalorder %v455_v34, 0  ;;  %vm458_vm12 = vcmp.eq.s32.totalorder %v455_v34, 1  ;;  %vm461_vm13 = vcmp.eq.s32.totalorder %v455_v34, 2 }
 0x3f2   :  { %503 = vpush %v368_v38  ;;  %551 = vrsqrt.f32 %v442_v44  ;;  %vm445_vm8 = vcmp.eq.f32.partialorder %v442_v44, inf  ;;  %v448_v5 = vand.u32 2147483648, %v442_v44  ;;  %vm447_vm10 = vcmp.eq.f32.partialorder %v442_v44, 0.0 }
 0x3f4   :  { %v542_v41 = vpop.eup %541 }
 0x3f5   :  { %v544_v42 = vpop.eup %543  ;;  %v392_v43 = vmul.f32 %v542_v41, %v390_v39 }
 0x3f6   :  { %v379_v11 = vmul.f32 %v544_v42, %v377_v18  ;;  %v546_v1 = vpop.eup %545 }
 0x3f7   :  { %v394_v2 = vsel %vm393_vm15, %v390_v39, %v392_v43  ;;  %v405_v12 = vmul.f32 %v546_v1, %v403_v6 }
 0x3f8   :  { %v548_v0 = vpop.eup %547  ;;  %v381_v46 = vsel %vm380_vm0, %v377_v18, %v379_v11  ;;  %v397_v49 = vsel %vm395_vm1, %v396_v4, %v394_v2 }
 0x3f9   :  { %v418_v51 = vmul.f32 %v548_v0, %v416_v40  ;;  %v384_v52 = vsel %vm382_vm2, %v383_v48, %v381_v46  ;;  %v407_v53 = vsel %vm406_vm3, %v403_v6, %v405_v12  ;;  %v550_v54 = vpop.eup %549 }
 0x3fa   :  { %v398_v45 = vadd.f32 %v397_v49, %v384_v52  ;;  %v410_v56 = vsel %vm408_vm5, %v409_v55, %v407_v53  ;;  %v431_v57 = vmul.f32 %v550_v54, %v429_v10 }
 0x3fb   :  { %v420_v8 = vsel %vm419_vm4, %v416_v40, %v418_v51 }
 0x3fc   :  { %v552_v50 = vpop.eup %551  ;;  %v411_v58 = vadd.f32 %v410_v56, %v398_v45  ;;  %v423_v9 = vsel %vm421_vm6, %v422_v47, %v420_v8  ;;  %v433_v60 = vsel %vm432_vm7, %v429_v10, %v431_v57 }
 0x3fd   :  { %v444_v59 = vmul.f32 %v552_v50, %v442_v44  ;;  %v436_v3 = vsel %vm434_vm9, %v435_v62, %v433_v60 }
 0x3fe   :  { %v424_v61 = vadd.f32 %v423_v9, %v411_v58 }
 0x3ff   :  { %v446_v63 = vsel %vm445_vm8, %v442_v44, %v444_v59 }
 0x400   :  { %v437_v7 = vadd.f32 %v436_v3, %v424_v61  ;;  %v449_v13 = vsel %vm447_vm10, %v448_v5, %v446_v63 }
 0x402   :  { %v450_v17 = vadd.f32 %v449_v13, %v437_v7 }
 0x404   :  { %v451_v26 = vsub.f32 0.0, %v450_v17 }
 0x406   :  { %v453_v38 = vmul.f32 0.16666667, %v451_v26 }
 0x408   :  { %v462_v40 = vsel %vm461_vm13, %v453_v38, 0.0 }
 0x41b   :  { %s492_s21 = spop %491 }
 0x41c   :  { %s494_s22 = spop %493  ;;  %v167_v14 = vstv %s492_s21 }
 0x41d   :  { %v203_v15 = vstv %s494_s22  ;;  %v169_v20 = vmul.f32 0.125, %v167_v14 }
 0x41e   :  { %v204_v21 = vmul.f32 0.125, %v203_v15 }
 0x41f   :  { %s496_s23 = spop %495 }
 0x420   :  { %v238_v16 = vstv %s496_s23  ;;  %s498_s24 = spop %497  ;;  %v205_v30 = vadd.f32 %v204_v21, %v169_v20 }
 0x421   :  { %v271_v22 = vstv %s498_s24  ;;  %s500_s25 = spop %499  ;;  %v239_v27 = vmul.f32 0.125, %v238_v16 }
 0x422   :  { %v272_v24 = vmul.f32 0.125, %v271_v22  ;;  %v304_v25 = vstv %s500_s25  ;;  %s502_s26 = spop %501 }
 0x423   :  { %v305_v28 = vmul.f32 0.125, %v304_v25  ;;  %v337_v19 = vstv %s502_s26  ;;  %s504_s27 = spop %503  ;;  %v240_v35 = vadd.f32 %v239_v27, %v205_v30 }
 0x424   :  { %v370_v29 = vstv %s504_s27  ;;  %v338_v32 = vmul.f32 0.125, %v337_v19 }
 0x425   :  { %v306_v31 = vadd.f32 %v305_v28, %v272_v24  ;;  %v371_v33 = vmul.f32 0.125, %v370_v29  ;;  %v457_v18 = vsel %vm456_vm11, %v240_v35, 0.0 }
 0x427   :  { %v339_v36 = vadd.f32 %v338_v32, %v306_v31 }
 0x429   :  { %v372_v37 = vadd.f32 %v371_v33, %v339_v36 }
 0x42b   :  { %v459_v39 = vsel %vm458_vm12, %v372_v37, 0.0 }
 0x42c   :  { %v460_v6 = vadd.f32 %v459_v39, %v457_v18 }
 0x42e   :  { %v463_v41 = vadd.f32 %v462_v40, %v460_v6 }
 0x430   :  { %464 = vst [vmem:[%s716_s1] sm:$0x1] %v463_v41 }
 0x431   :  { %469 = vsyncpa [#allocation3], 1 }

</bundles_post_ra>
